<compile_context>
chip_gen: v7x
topology: tpu7x:2x2x1
jax: 0.10.0
libtpu: 0.0.40
codegen_flags: <defaults>
</compile_context>

<pallas_src>
import numpy as np
import jax
import jax.numpy as jnp
from jax.experimental import pallas as pl
from jax.experimental.pallas import tpu as pltpu

# ---- Model hyperparameters (net_parameters = D_g, CL1_F, CL1_K, FC1_F,
#      FC2_F, NN_FC1, NN_FC2, out_dim) ----
D_G     = 16     # number of graph vertices V (= in_dim = num_gene)
CL1_F   = 8      # graph conv output features
CL1_K   = 4      # Chebyshev order
FC1_F   = 32
FC2_F   = 16     # != 0, so the fc2->relu->dropout->fc3 decoder branch runs
NN_FC1  = 32
NN_FC2  = 16
OUT_DIM = 8
POOL    = 8      # graph max-pool size
NGROUP  = D_G // POOL           # 2
FC1FIN  = CL1_F * NGROUP        # 16
BATCH   = 2
LANES   = 128

# ---- static row offsets inside the packed parameter slab (all cols start 0) --
R_WEFF  = 0                     # (D_G, D_G*CL1_F) = (16, 128)  folded cheb+cl1
R_WFC1  = R_WEFF + D_G          # (FC1FIN, FC1_F)  = (16, 32)
R_WFC2  = R_WFC1 + FC1FIN       # (FC1_F, FC2_F)   = (32, 16)
R_WFC3  = R_WFC2 + FC1_F        # (FC2_F, D_G)     = (16, 16)
R_WNN1  = R_WFC3 + FC2_F        # (D_G, NN_FC1)    = (16, 32)
R_WNN2  = R_WNN1 + D_G          # (NN_FC1, NN_FC2) = (32, 16)
R_WS2H  = R_WNN2 + NN_FC1       # (FC1_F, OUT_DIM) = (32, 8)   W_sum2[:FC1_F]
R_WS2N  = R_WS2H + FC1_F        # (NN_FC2, OUT_DIM)= (16, 8)   W_sum2[FC1_F:]
R_BCL1  = R_WS2N + NN_FC2       # (1, 128) cl1 bias tiled over vertices
R_BFC1  = R_BCL1 + 1            # (1, FC1_F)
R_BFC2  = R_BFC1 + 1            # (1, FC2_F)
R_BFC3  = R_BFC2 + 1            # (1, D_G)
R_BNN1  = R_BFC3 + 1            # (1, NN_FC1)
R_BNN2  = R_BNN1 + 1            # (1, NN_FC2)
R_BSUM2 = R_BNN2 + 1            # (1, OUT_DIM)
P_ROWS  = ((R_BSUM2 + 1 + 7) // 8) * 8          # 184


def _round_up(n, m):
    return ((n + m - 1) // m) * m


# --------------------------------- kernel ------------------------------------

def graph_gcn_kernel(x_ref, p_ref, out_ref):
    x = x_ref[...]                                           # (BM, D_G)

    # --- graph conv: Chebyshev recursion + cl1 folded into one matmul ---
    w_eff = p_ref[R_WEFF:R_WEFF + D_G, :]                    # (16, 128)
    b_cl1 = p_ref[R_BCL1:R_BCL1 + 1, :]                      # (1, 128)
    # column layout of y: col = pool_pos*FC1FIN + group*CL1_F + feature
    y = jnp.dot(x, w_eff, preferred_element_type=jnp.float32) + b_cl1
    y = jnp.maximum(y, 0.0)                                  # ReLU, (BM, 128)

    # --- graph max-pool over vertices (window POOL) via lane-slice folds ---
    h = y[:, 0:FC1FIN]
    for p in range(1, POOL):
        h = jnp.maximum(h, y[:, p * FC1FIN:(p + 1) * FC1FIN])  # (BM, 16)

    # --- fc1 + ReLU -> x_hidden_gae ---
    wfc1 = p_ref[R_WFC1:R_WFC1 + FC1FIN, 0:FC1_F]
    bfc1 = p_ref[R_BFC1:R_BFC1 + 1, 0:FC1_F]
    hid = jnp.dot(h, wfc1, preferred_element_type=jnp.float32) + bfc1
    hid = jnp.maximum(hid, 0.0)                              # (BM, FC1_F)

    # --- decoder: fc2 -> ReLU -> Dropout(p) -> fc3 -> x_decode_gae ---
    wfc2 = p_ref[R_WFC2:R_WFC2 + FC1_F, 0:FC2_F]
    bfc2 = p_ref[R_BFC2:R_BFC2 + 1, 0:FC2_F]
    d = jnp.maximum(jnp.dot(hid, wfc2, preferred_element_type=jnp.float32) + bfc2, 0.0)
    # TODO(synk): stochastic dropout (p > 0) not implemented in-kernel; p = 0 -> identity.
    wfc3 = p_ref[R_WFC3:R_WFC3 + FC2_F, 0:D_G]
    bfc3 = p_ref[R_BFC3:R_BFC3 + 1, 0:D_G]
    d = jnp.dot(d, wfc3, preferred_element_type=jnp.float32) + bfc3   # (BM, D_G)

    # --- NN branch on the raw input: nn_fc1 -> ReLU -> nn_fc2 -> ReLU ---
    wnn1 = p_ref[R_WNN1:R_WNN1 + D_G, 0:NN_FC1]
    bnn1 = p_ref[R_BNN1:R_BNN1 + 1, 0:NN_FC1]
    xn = jnp.maximum(jnp.dot(x, wnn1, preferred_element_type=jnp.float32) + bnn1, 0.0)
    wnn2 = p_ref[R_WNN2:R_WNN2 + NN_FC1, 0:NN_FC2]
    bnn2 = p_ref[R_BNN2:R_BNN2 + 1, 0:NN_FC2]
    xn = jnp.maximum(jnp.dot(xn, wnn2, preferred_element_type=jnp.float32) + bnn2, 0.0)

    # --- FC_sum2(concat(hidden, nn)) as two split matmuls + log_softmax ---
    ws2h = p_ref[R_WS2H:R_WS2H + FC1_F, 0:OUT_DIM]
    ws2n = p_ref[R_WS2N:R_WS2N + NN_FC2, 0:OUT_DIM]
    bs2  = p_ref[R_BSUM2:R_BSUM2 + 1, 0:OUT_DIM]
    z = (jnp.dot(hid, ws2h, preferred_element_type=jnp.float32)
         + jnp.dot(xn, ws2n, preferred_element_type=jnp.float32) + bs2)
    zs = z - jnp.max(z, axis=1, keepdims=True)
    logsm = zs - jnp.log(jnp.sum(jnp.exp(zs), axis=1, keepdims=True))

    # --- pack the three results into one lane-dense (BM, 128) output slab ---
    out_ref[...] = jnp.zeros_like(out_ref)
    out_ref[:, 0:D_G] = d
    out_ref[:, D_G:D_G + FC1_F] = hid
    out_ref[:, D_G + FC1_F:D_G + FC1_F + OUT_DIM] = logsm


# ------------------------ host-side packing / wrapper -------------------------

def _cheb_basis(L_res, K):
    """T_0..T_{K-1} Chebyshev polynomials of the (rescaled) Laplacian."""
    L = np.asarray(L_res, np.float64)
    V = L.shape[0]
    Ts = [np.eye(V)]
    if K > 1:
        Ts.append(L.copy())
    for _ in range(2, K):
        Ts.append(2.0 * (L @ Ts[-1]) - Ts[-2])
    return np.stack(Ts, 0)                                   # (K, V, V) float64


def pack_params(L_res, params):
    """Fold Chebyshev basis into cl1 and pack everything into one f32 slab."""
    (wcl1, bcl1, wfc1, bfc1, wfc2, bfc2, wfc3, bfc3,
     wnn1, bnn1, wnn2, bnn2, wsum2, bsum2) = [np.asarray(p, np.float64) for p in params]

    Tb = _cheb_basis(L_res, CL1_K)                           # (K, V, V)
    # y[b,v,f] = sum_u x[b,u] * M[u,v,f],  M[u,v,f] = sum_k T_k[v,u]*wcl1[k,f]
    M = np.einsum('kvu,kf->uvf', Tb, wcl1)                   # (V, V, F)
    # reorder columns to (pool_pos, group, feature): col = p*FC1FIN + g*F + f
    M = M.reshape(D_G, NGROUP, POOL, CL1_F).transpose(0, 2, 1, 3)
    w_eff = M.reshape(D_G, D_G * CL1_F)                      # (16, 128)
    b_cl1 = np.tile(bcl1.reshape(1, CL1_F), (1, D_G))        # (1, 128)

    slab = np.zeros((P_ROWS, LANES), np.float32)

    def put(r, m):
        m = np.asarray(m, np.float32)
        slab[r:r + m.shape[0], 0:m.shape[1]] = m

    put(R_WEFF, w_eff)
    put(R_WFC1, wfc1)
    put(R_WFC2, wfc2)
    put(R_WFC3, wfc3)
    put(R_WNN1, wnn1)
    put(R_WNN2, wnn2)
    put(R_WS2H, wsum2[:FC1_F])
    put(R_WS2N, wsum2[FC1_F:])
    put(R_BCL1, b_cl1)
    put(R_BFC1, bfc1.reshape(1, -1))
    put(R_BFC2, bfc2.reshape(1, -1))
    put(R_BFC3, bfc3.reshape(1, -1))
    put(R_BNN1, bnn1.reshape(1, -1))
    put(R_BNN2, bnn2.reshape(1, -1))
    put(R_BSUM2, bsum2.reshape(1, -1))
    return jnp.asarray(slab)


def graph_gcn_forward(x, L_rescaled, params):
    x = jnp.asarray(x, jnp.float32)
    B = x.shape[0]
    # batch tile: multiple of 8 sublanes, up to 128 rows per grid step
    BM = min(128, _round_up(max(B, 1), 8))
    B_pad = _round_up(B, BM)
    x_pad = jnp.zeros((B_pad, D_G), jnp.float32).at[:B].set(x)
    slab = pack_params(L_rescaled, params)

    fn = pl.pallas_call(
        graph_gcn_kernel,
        out_shape=jax.ShapeDtypeStruct((B_pad, LANES), jnp.float32),
        grid=(B_pad // BM,),
        in_specs=[
            pl.BlockSpec((BM, D_G), lambda i: (i, 0)),          # x batch tile
            pl.BlockSpec((P_ROWS, LANES), lambda i: (0, 0)),    # param slab
        ],
        out_specs=pl.BlockSpec((BM, LANES), lambda i: (i, 0)),  # packed outputs
        compiler_params=pltpu.CompilerParams(
            dimension_semantics=("parallel",)),                 # megacore on v7x
    )
    out = fn(x_pad, slab)                                       # (B_pad, 128)

    x_decode = out[:B, 0:D_G]
    x_hidden = out[:B, D_G:D_G + FC1_F]
    x_logsm = out[:B, D_G + FC1_F:D_G + FC1_F + OUT_DIM]
    x_reAdj = 0   # as in the PyTorch forward
    return x_decode, x_hidden, x_logsm, x_reAdj


# ---------------- deterministic parameter / input construction ----------------

def init_params(key):
    def linear(k, fin, fout):
        k1, k2 = jax.random.split(k)
        s = 1.0 / np.sqrt(fin)
        w = jax.random.uniform(k1, (fin, fout), jnp.float32, -s, s)   # (in, out)
        b = jax.random.uniform(k2, (1, fout), jnp.float32, -s, s)
        return w, b

    ks = jax.random.split(key, 7)
    wcl1, bcl1   = linear(ks[0], CL1_K, CL1_F)
    wfc1, bfc1   = linear(ks[1], FC1FIN, FC1_F)
    wfc2, bfc2   = linear(ks[2], FC1_F, FC2_F)
    wfc3, bfc3   = linear(ks[3], FC2_F, D_G)
    wnn1, bnn1   = linear(ks[4], D_G, NN_FC1)
    wnn2, bnn2   = linear(ks[5], NN_FC1, NN_FC2)
    wsum2, bsum2 = linear(ks[6], FC1_F + NN_FC2, OUT_DIM)
    return (wcl1, bcl1, wfc1, bfc1, wfc2, bfc2, wfc3, bfc3,
            wnn1, bnn1, wnn2, bnn2, wsum2, bsum2)


def make_rescaled_laplacian(key, V):
    # Synthetic dense graph: symmetric normalized Laplacian, then
    # rescale_L(L, lmax) = 2 * L / lmax - I   (lmax = largest eigenvalue).
    a = np.asarray(jax.random.uniform(key, (V, V), jnp.float32, 0.0, 1.0))
    A = (a + a.T) * 0.5
    np.fill_diagonal(A, 0.0)
    deg = A.sum(1)
    dinv = 1.0 / np.sqrt(np.maximum(deg, 1e-6))
    Lap = np.eye(V, dtype=np.float64) - (dinv[:, None] * A * dinv[None, :])
    lmax = float(np.linalg.eigvalsh(Lap).max())
    L_res = (2.0 / lmax) * Lap - np.eye(V)
    return jnp.asarray(L_res, jnp.float32)


def reference_forward(x, L_res, params):
    # Pure-numpy reference mirroring the PyTorch forward (dropout p = 0).
    (wcl1, bcl1, wfc1, bfc1, wfc2, bfc2, wfc3, bfc3,
     wnn1, bnn1, wnn2, bnn2, wsum2, bsum2) = [np.asarray(p) for p in params]
    x = np.asarray(x); L = np.asarray(L_res)
    B, V = x.shape
    x0 = x.T                                        # (V, B), Fin = 1
    cheb = [x0]
    if CL1_K > 1:
        x1 = L @ x0
        cheb.append(x1)
        for _ in range(2, CL1_K):
            x2 = 2.0 * (L @ x1) - x0
            cheb.append(x2)
            x0, x1 = x1, x2
    xk = np.stack(cheb, 0)                          # (K, V, B)
    feat = xk.transpose(2, 1, 0).reshape(B * V, CL1_K)
    y = np.maximum(feat @ wcl1 + bcl1, 0.0).reshape(B, V, CL1_F)
    y = y.reshape(B, V // POOL, POOL, CL1_F).max(2).reshape(B, FC1FIN)
    h = np.maximum(y @ wfc1 + bfc1, 0.0)
    d = np.maximum(h @ wfc2 + bfc2, 0.0)
    d = d @ wfc3 + bfc3
    xn = np.maximum(x @ wnn1 + bnn1, 0.0)
    xn = np.maximum(xn @ wnn2 + bnn2, 0.0)
    z = np.concatenate([h, xn], 1) @ wsum2 + bsum2
    zs = z - z.max(1, keepdims=True)
    logsm = zs - np.log(np.exp(zs).sum(1, keepdims=True))
    return d, h, logsm


if __name__ == "__main__":
    key = jax.random.PRNGKey(0)
    kx, kL, kp = jax.random.split(key, 3)
    x = jax.random.normal(kx, (BATCH, D_G), jnp.float32)
    L_res = make_rescaled_laplacian(kL, D_G)
    params = init_params(kp)

    x_decode, x_hidden, x_logsm, x_reAdj = graph_gcn_forward(x, L_res, params)
    jax.block_until_ready((x_decode, x_hidden, x_logsm))

    d_ref, h_ref, l_ref = reference_forward(x, L_res, params)
    assert np.allclose(np.asarray(x_decode), d_ref, rtol=1e-4, atol=1e-4)
    assert np.allclose(np.asarray(x_hidden), h_ref, rtol=1e-4, atol=1e-4)
    assert np.allclose(np.asarray(x_logsm), l_ref, rtol=1e-4, atol=1e-4)
    assert x_reAdj == 0
    print("KERNEL_OK")
</pallas_src>

<mosaic_0001>
module attributes {stable_mosaic.version = 11 : i64} {
  func.func @graph_gcn_kernel(%arg0: i32, %arg1: memref<8x16xf32, #tpu.memory_space<vmem>>, %arg2: memref<184x128xf32, #tpu.memory_space<vmem>>, %arg3: memref<8x128xf32, #tpu.memory_space<vmem>>) attributes {dimension_semantics = [#tpu.dimension_semantics<parallel>], iteration_bounds = array<i64: 1>, scalar_prefetch = 0 : i64, scratch_operands = 0 : i64, tpu.core_type = #tpu.core_type<tc>, window_params = [{transform_indices = @transform_0, window_bounds = array<i64: 8, 16>}, {pipeline_mode = #tpu.pipeline_mode<synchronous>, transform_indices = @transform_1, window_bounds = array<i64: 184, 128>}, {transform_indices = @transform_2, window_bounds = array<i64: 8, 128>}]} {
    %c0 = arith.constant 0 : index
    %c0_0 = arith.constant 0 : index
    %0 = vector.load %arg1[%c0, %c0_0] : memref<8x16xf32, #tpu.memory_space<vmem>>, vector<8x16xf32>
    %c0_1 = arith.constant 0 : index
    %c0_2 = arith.constant 0 : index
    %1 = vector.load %arg2[%c0_1, %c0_2] : memref<184x128xf32, #tpu.memory_space<vmem>>, vector<16x128xf32>
    %c176 = arith.constant 176 : index
    %c0_3 = arith.constant 0 : index
    %2 = vector.load %arg2[%c176, %c0_3] : memref<184x128xf32, #tpu.memory_space<vmem>>, vector<1x128xf32>
    %cst = arith.constant dense<0.000000e+00> : vector<8x128xf32>
    %3 = tpu.matmul %0, %1, %cst {dimension_numbers = #tpu.dot_dimension_numbers<[1], [0], [0], [1], [0, 0, 1, 1], [], []>} : vector<8x16xf32>, vector<16x128xf32>, vector<8x128xf32> -> vector<8x128xf32>
    %4 = vector.broadcast %2 : vector<1x128xf32> to vector<8x128xf32>
    %5 = arith.addf %3, %4 : vector<8x128xf32>
    %cst_4 = arith.constant 0.000000e+00 : f32
    %6 = vector.broadcast %cst_4 : f32 to vector<8x128xf32>
    %7 = arith.maximumf %5, %6 : vector<8x128xf32>
    %8 = vector.extract_strided_slice %7 {offsets = [0, 0], sizes = [8, 16], strides = [1, 1]} : vector<8x128xf32> to vector<8x16xf32>
    %9 = vector.extract_strided_slice %7 {offsets = [0, 16], sizes = [8, 16], strides = [1, 1]} : vector<8x128xf32> to vector<8x16xf32>
    %10 = arith.maximumf %8, %9 : vector<8x16xf32>
    %11 = vector.extract_strided_slice %7 {offsets = [0, 32], sizes = [8, 16], strides = [1, 1]} : vector<8x128xf32> to vector<8x16xf32>
    %12 = arith.maximumf %10, %11 : vector<8x16xf32>
    %13 = vector.extract_strided_slice %7 {offsets = [0, 48], sizes = [8, 16], strides = [1, 1]} : vector<8x128xf32> to vector<8x16xf32>
    %14 = arith.maximumf %12, %13 : vector<8x16xf32>
    %15 = vector.extract_strided_slice %7 {offsets = [0, 64], sizes = [8, 16], strides = [1, 1]} : vector<8x128xf32> to vector<8x16xf32>
    %16 = arith.maximumf %14, %15 : vector<8x16xf32>
    %17 = vector.extract_strided_slice %7 {offsets = [0, 80], sizes = [8, 16], strides = [1, 1]} : vector<8x128xf32> to vector<8x16xf32>
    %18 = arith.maximumf %16, %17 : vector<8x16xf32>
    %19 = vector.extract_strided_slice %7 {offsets = [0, 96], sizes = [8, 16], strides = [1, 1]} : vector<8x128xf32> to vector<8x16xf32>
    %20 = arith.maximumf %18, %19 : vector<8x16xf32>
    %21 = vector.extract_strided_slice %7 {offsets = [0, 112], sizes = [8, 16], strides = [1, 1]} : vector<8x128xf32> to vector<8x16xf32>
    %22 = arith.maximumf %20, %21 : vector<8x16xf32>
    %c16 = arith.constant 16 : index
    %c0_5 = arith.constant 0 : index
    %23 = vector.load %arg2[%c16, %c0_5] : memref<184x128xf32, #tpu.memory_space<vmem>>, vector<16x32xf32>
    %c177 = arith.constant 177 : index
    %c0_6 = arith.constant 0 : index
    %24 = vector.load %arg2[%c177, %c0_6] : memref<184x128xf32, #tpu.memory_space<vmem>>, vector<1x32xf32>
    %cst_7 = arith.constant dense<0.000000e+00> : vector<8x32xf32>
    %25 = tpu.matmul %22, %23, %cst_7 {dimension_numbers = #tpu.dot_dimension_numbers<[1], [0], [0], [1], [0, 0, 1, 1], [], []>} : vector<8x16xf32>, vector<16x32xf32>, vector<8x32xf32> -> vector<8x32xf32>
    %26 = vector.broadcast %24 : vector<1x32xf32> to vector<8x32xf32>
    %27 = arith.addf %25, %26 : vector<8x32xf32>
    %cst_8 = arith.constant 0.000000e+00 : f32
    %28 = vector.broadcast %cst_8 : f32 to vector<8x32xf32>
    %29 = arith.maximumf %27, %28 : vector<8x32xf32>
    %c32 = arith.constant 32 : index
    %c0_9 = arith.constant 0 : index
    %30 = vector.load %arg2[%c32, %c0_9] : memref<184x128xf32, #tpu.memory_space<vmem>>, vector<32x16xf32>
    %c178 = arith.constant 178 : index
    %c0_10 = arith.constant 0 : index
    %31 = vector.load %arg2[%c178, %c0_10] : memref<184x128xf32, #tpu.memory_space<vmem>>, vector<1x16xf32>
    %cst_11 = arith.constant dense<0.000000e+00> : vector<8x16xf32>
    %32 = tpu.matmul %29, %30, %cst_11 {dimension_numbers = #tpu.dot_dimension_numbers<[1], [0], [0], [1], [0, 0, 1, 1], [], []>} : vector<8x32xf32>, vector<32x16xf32>, vector<8x16xf32> -> vector<8x16xf32>
    %33 = vector.broadcast %31 : vector<1x16xf32> to vector<8x16xf32>
    %34 = arith.addf %32, %33 : vector<8x16xf32>
    %cst_12 = arith.constant 0.000000e+00 : f32
    %35 = vector.broadcast %cst_12 : f32 to vector<8x16xf32>
    %36 = arith.maximumf %34, %35 : vector<8x16xf32>
    %c64 = arith.constant 64 : index
    %c0_13 = arith.constant 0 : index
    %37 = vector.load %arg2[%c64, %c0_13] : memref<184x128xf32, #tpu.memory_space<vmem>>, vector<16x16xf32>
    %c179 = arith.constant 179 : index
    %c0_14 = arith.constant 0 : index
    %38 = vector.load %arg2[%c179, %c0_14] : memref<184x128xf32, #tpu.memory_space<vmem>>, vector<1x16xf32>
    %cst_15 = arith.constant dense<0.000000e+00> : vector<8x16xf32>
    %39 = tpu.matmul %36, %37, %cst_15 {dimension_numbers = #tpu.dot_dimension_numbers<[1], [0], [0], [1], [0, 0, 1, 1], [], []>} : vector<8x16xf32>, vector<16x16xf32>, vector<8x16xf32> -> vector<8x16xf32>
    %40 = vector.broadcast %38 : vector<1x16xf32> to vector<8x16xf32>
    %41 = arith.addf %39, %40 : vector<8x16xf32>
    %c80 = arith.constant 80 : index
    %c0_16 = arith.constant 0 : index
    %42 = vector.load %arg2[%c80, %c0_16] : memref<184x128xf32, #tpu.memory_space<vmem>>, vector<16x32xf32>
    %c180 = arith.constant 180 : index
    %c0_17 = arith.constant 0 : index
    %43 = vector.load %arg2[%c180, %c0_17] : memref<184x128xf32, #tpu.memory_space<vmem>>, vector<1x32xf32>
    %cst_18 = arith.constant dense<0.000000e+00> : vector<8x32xf32>
    %44 = tpu.matmul %0, %42, %cst_18 {dimension_numbers = #tpu.dot_dimension_numbers<[1], [0], [0], [1], [0, 0, 1, 1], [], []>} : vector<8x16xf32>, vector<16x32xf32>, vector<8x32xf32> -> vector<8x32xf32>
    %45 = vector.broadcast %43 : vector<1x32xf32> to vector<8x32xf32>
    %46 = arith.addf %44, %45 : vector<8x32xf32>
    %cst_19 = arith.constant 0.000000e+00 : f32
    %47 = vector.broadcast %cst_19 : f32 to vector<8x32xf32>
    %48 = arith.maximumf %46, %47 : vector<8x32xf32>
    %c96 = arith.constant 96 : index
    %c0_20 = arith.constant 0 : index
    %49 = vector.load %arg2[%c96, %c0_20] : memref<184x128xf32, #tpu.memory_space<vmem>>, vector<32x16xf32>
    %c181 = arith.constant 181 : index
    %c0_21 = arith.constant 0 : index
    %50 = vector.load %arg2[%c181, %c0_21] : memref<184x128xf32, #tpu.memory_space<vmem>>, vector<1x16xf32>
    %cst_22 = arith.constant dense<0.000000e+00> : vector<8x16xf32>
    %51 = tpu.matmul %48, %49, %cst_22 {dimension_numbers = #tpu.dot_dimension_numbers<[1], [0], [0], [1], [0, 0, 1, 1], [], []>} : vector<8x32xf32>, vector<32x16xf32>, vector<8x16xf32> -> vector<8x16xf32>
    %52 = vector.broadcast %50 : vector<1x16xf32> to vector<8x16xf32>
    %53 = arith.addf %51, %52 : vector<8x16xf32>
    %cst_23 = arith.constant 0.000000e+00 : f32
    %54 = vector.broadcast %cst_23 : f32 to vector<8x16xf32>
    %55 = arith.maximumf %53, %54 : vector<8x16xf32>
    %c128 = arith.constant 128 : index
    %c0_24 = arith.constant 0 : index
    %56 = vector.load %arg2[%c128, %c0_24] : memref<184x128xf32, #tpu.memory_space<vmem>>, vector<32x8xf32>
    %c160 = arith.constant 160 : index
    %c0_25 = arith.constant 0 : index
    %57 = vector.load %arg2[%c160, %c0_25] : memref<184x128xf32, #tpu.memory_space<vmem>>, vector<16x8xf32>
    %c182 = arith.constant 182 : index
    %c0_26 = arith.constant 0 : index
    %58 = vector.load %arg2[%c182, %c0_26] : memref<184x128xf32, #tpu.memory_space<vmem>>, vector<1x8xf32>
    %cst_27 = arith.constant dense<0.000000e+00> : vector<8x8xf32>
    %59 = tpu.matmul %29, %56, %cst_27 {dimension_numbers = #tpu.dot_dimension_numbers<[1], [0], [0], [1], [0, 0, 1, 1], [], []>} : vector<8x32xf32>, vector<32x8xf32>, vector<8x8xf32> -> vector<8x8xf32>
    %cst_28 = arith.constant dense<0.000000e+00> : vector<8x8xf32>
    %60 = tpu.matmul %55, %57, %cst_28 {dimension_numbers = #tpu.dot_dimension_numbers<[1], [0], [0], [1], [0, 0, 1, 1], [], []>} : vector<8x16xf32>, vector<16x8xf32>, vector<8x8xf32> -> vector<8x8xf32>
    %61 = arith.addf %59, %60 : vector<8x8xf32>
    %62 = vector.broadcast %58 : vector<1x8xf32> to vector<8x8xf32>
    %63 = arith.addf %61, %62 : vector<8x8xf32>
    %cst_29 = arith.constant dense<0xFF800000> : vector<8xf32>
    %64 = vector.multi_reduction <maximumf>, %63, %cst_29 [1] : vector<8x8xf32> to vector<8xf32>
    %65 = vector.shape_cast %64 : vector<8xf32> to vector<8x1xf32>
    %66 = vector.broadcast %65 : vector<8x1xf32> to vector<8x8xf32>
    %67 = arith.subf %63, %66 : vector<8x8xf32>
    %68 = math.exp %67 : vector<8x8xf32>
    %cst_30 = arith.constant dense<0.000000e+00> : vector<8xf32>
    %69 = vector.multi_reduction <add>, %68, %cst_30 [1] : vector<8x8xf32> to vector<8xf32>
    %70 = vector.shape_cast %69 : vector<8xf32> to vector<8x1xf32>
    %71 = math.log %70 : vector<8x1xf32>
    %72 = vector.broadcast %71 : vector<8x1xf32> to vector<8x8xf32>
    %73 = arith.subf %67, %72 : vector<8x8xf32>
    %cst_31 = arith.constant 0.000000e+00 : f32
    %74 = vector.broadcast %cst_31 : f32 to vector<8x128xf32>
    %c0_32 = arith.constant 0 : index
    %c0_33 = arith.constant 0 : index
    %75 = vector.load %arg3[%c0_32, %c0_33] : memref<8x128xf32, #tpu.memory_space<vmem>>, vector<8x128xf32>
    tpu.vector_store %arg3[%c0_32, %c0_33], %74 {strides = array<i32>} : memref<8x128xf32, #tpu.memory_space<vmem>>, vector<8x128xf32>,
    %c0_34 = arith.constant 0 : index
    %c0_35 = arith.constant 0 : index
    %76 = vector.load %arg3[%c0_34, %c0_35] : memref<8x128xf32, #tpu.memory_space<vmem>>, vector<8x16xf32>
    tpu.vector_store %arg3[%c0_34, %c0_35], %41 {strides = array<i32>} : memref<8x128xf32, #tpu.memory_space<vmem>>, vector<8x16xf32>,
    %c0_36 = arith.constant 0 : index
    %c16_37 = arith.constant 16 : index
    %77 = vector.load %arg3[%c0_36, %c16_37] : memref<8x128xf32, #tpu.memory_space<vmem>>, vector<8x32xf32>
    tpu.vector_store %arg3[%c0_36, %c16_37], %29 {strides = array<i32>} : memref<8x128xf32, #tpu.memory_space<vmem>>, vector<8x32xf32>,
    %c0_38 = arith.constant 0 : index
    %c48 = arith.constant 48 : index
    %78 = vector.load %arg3[%c0_38, %c48] : memref<8x128xf32, #tpu.memory_space<vmem>>, vector<8x8xf32>
    tpu.vector_store %arg3[%c0_38, %c48], %73 {strides = array<i32>} : memref<8x128xf32, #tpu.memory_space<vmem>>, vector<8x8xf32>,
    return
  }
  func.func @transform_0(%arg0: i32) -> (i32, i32) {
    %c0_i32 = arith.constant 0 : i32
    %c0_i32_0 = arith.constant 0 : i32
    return %arg0, %c0_i32 : i32, i32
  }
  func.func @transform_1(%arg0: i32) -> (i32, i32) {
    %c0_i32 = arith.constant 0 : i32
    %c0_i32_0 = arith.constant 0 : i32
    %c0_i32_1 = arith.constant 0 : i32
    return %c0_i32, %c0_i32_0 : i32, i32
  }
  func.func @transform_2(%arg0: i32) -> (i32, i32) {
    %c0_i32 = arith.constant 0 : i32
    %c0_i32_0 = arith.constant 0 : i32
    return %arg0, %c0_i32 : i32, i32
  }
}

</mosaic_0001>

<bundles_post_ra>
// kernel: tpu_custom_call.1
= control target key start
LH: loop header
LB: loop body
LE: loop exit
PB: predicated region body
PF: predicated region fallthrough
CT: control target
= control target key end

     0   :  { %7 = vsyncpa [#allocation3], 0  ;;  %s1113_s0 = inlined_call_operand.hbm [shape: f32[8,16], index: 0, kind: input, shape index: {}]   ;;  %s1114_s1 = inlined_call_operand.hbm [shape: f32[184,128], index: 1, kind: input, shape index: {}]   ;;  %s1115_s2 = inlined_call_operand.hbm [shape: f32[8,128], index: 2, kind: output, shape index: {}]  }
   0x1   :  { %8 = vsyncpa [#allocation6], 0 }
   0x2   :  { %9 = vsyncpa [#allocation4], 0  ;;  %s990_s9 = smov [#allocation2]   ;;  %s991_s11 = smov [#allocation5]  }
   0x3   :  { %s16_s10 = sshll.u32 %s990_s9, 4  ;;  %s25_s12 = sshll.u32 %s991_s11, 4  ;;  %s17_s10 = int_to_ptr.vmem [resolvable:$true] %s16_s10  ;;  %s1020_s12 = int_to_ptr.vmem [resolvable:$true] %s25_s12 }
   0x4   :  { %s918_s15 = scalar_lea.hbm %s1113_s0, 128 }
   0x5   :  { %p919_p0 = scmp.ne.s32.totalorder %s1113_s0, %s918_s15  ;;  %p922_p1 = scmp.lt.u32.totalorder %s918_s15, %s1113_s0 }
   0x7   :  { %p924_p2 = pnand %p922_p1, %p919_p0 }
   0x9   :  { %927 = shalt.err (!%p924_p2)
}
   0xa   :  { %s928_s20 = scalar_lea.vmem %s17_s10, 128  ;;  %p933_p4 = scmp.lt.s32.totalorder %s17_s10, %s17_s10 }
   0xb   :  { %p929_p3 = scmp.ne.s32.totalorder %s17_s10, %s928_s20  ;;  %p934_p5 = scmp.lt.s32.totalorder %s928_s20, %s928_s20 }
   0xd   :  { %p935_p6 = por %p934_p5, %p933_p4 }
   0xf   :  { %p936_p7 = pnand %p935_p6, %p929_p3 }
  0x11   :  { %939 = shalt.err (!%p936_p7)
}
  0x12   :  { %19 = dma.hbm_to_vmem [thread:$0]  %s1113_s0, 128, %s17_s10, [#allocation3]  }
  0x13   :  { %s940_s25 = scalar_lea.hbm %s1114_s1, 2944 }
  0x14   :  { %p941_p8 = scmp.ne.s32.totalorder %s1114_s1, %s940_s25  ;;  %p944_p9 = scmp.lt.u32.totalorder %s940_s25, %s1114_s1 }
  0x16   :  { %p946_p10 = pnand %p944_p9, %p941_p8 }
  0x18   :  { %949 = shalt.err (!%p946_p10)
}
  0x19   :  { %s950_s30 = scalar_lea.vmem %s1020_s12, 2944  ;;  %p955_p12 = scmp.lt.s32.totalorder %s1020_s12, %s1020_s12 }
  0x1a   :  { %p951_p11 = scmp.ne.s32.totalorder %s1020_s12, %s950_s30  ;;  %p956_p13 = scmp.lt.s32.totalorder %s950_s30, %s950_s30 }
  0x1c   :  { %p957_p0 = por %p956_p13, %p955_p12 }
  0x1e   :  { %p958_p1 = pnand %p957_p0, %p951_p11 }
  0x20   :  { %961 = shalt.err (!%p958_p1)
}
  0x21   :  { %s992_s0 = smov 128   ;;  %s993_s3 = smov 8  }
  0x22   :  { %31 = dma.hbm_to_vmem [thread:$0]  %s1114_s1, 2944, %s1020_s12, [#allocation6], %s992_s0, %s992_s0, %s993_s3  }
  0x23   :  { %984 = dma.done.wait [#allocation3], 128  }
  0x24   :  { %985 = vsyncadd [#allocation3], 4294967168 }
  0x25   :  { %986 = dma.done.wait [#allocation6], 2944  }
  0x26   :  { %987 = vsyncadd [#allocation6], 4294964352  ;;  %v994_v0 = vmov 0.0|0.0   ;;  %vm995_vm0 = vmmov 0   ;;  %v996_v1 = vmov 0.0   ;;  %v39_v2 = vld [vmem:[#allocation5] sm:$0xff] }
  0x27   :  { %866 = vmatprep.subr.bf16.mxu0 %v994_v0  ;;  %802 = vmatprep.mubr.msk.f32.mxu0 %vm995_vm0, %v996_v1  ;;  %724 = vst [vmem:[#allocation7] sm:$0xff] %v996_v1  ;;  %v40_v3 = vld [vmem:[#allocation5 + $0x8] sm:$0xff]  ;;  %v1058_v5 = vld [vmem:[#allocation2] sm:$0xff]  ;;  %vm46_vm1 = vcmask 130048   ;;  %v753_v6 = vld [vmem:[#allocation5 + $0xb0] ss:$0 sm:$0xff] }
  0x28   :  { %869 = vmatprep.subr.bf16.mxu1 %v994_v0  ;;  %809 = vmatprep.mubr.msk.f32.mxu1 %vm995_vm0, %v996_v1  ;;  %v867_v4 = vpack.c.bf16 %v40_v3, %v39_v2  ;;  %v150_v10 = vld [vmem:[#allocation5 + $0x10] sm:$0xff]  ;;  %v151_v11 = vld [vmem:[#allocation5 + $0x18] sm:$0xff]  ;;  %s997_s1 = smov 80   ;;  %s998_s6 = smov 112   ;;  %v231_v14 = vld [vmem:[#allocation5 + $0x20] sm:$0xff]  ;;  %vm240_vm2 = vcmask 261120  }
  0x29   :  { %v870_v13 = vpack.c.bf16 %v151_v11, %v150_v10  ;;  %v232_v15 = vld [vmem:[#allocation5 + $0x28] sm:$0xff]  ;;  %s999_s7 = smov 64   ;;  %s1000_s8 = smov 96   ;;  %v233_v31 = vld [vmem:[#allocation5 + $0x30] sm:$0xff]  ;;  %v234_v32 = vld [vmem:[#allocation5 + $0x38] sm:$0xff]  ;;  %vm711_vm3 = vcmask 64512  }
  0x2a   :  { %868 = vmatpush3.bf16.msra.mxu0 %v867_v4  ;;  %v873_v16 = vpack.c.bf16 %v232_v15, %v231_v14  ;;  %s1001_s9 = smov 32   ;;  %s1002_s10 = smov 48   ;;  %v876_v33 = vpack.c.bf16 %v234_v32, %v233_v31  ;;  %v755_v34 = vld [vmem:[#allocation5 + $0xb1] ss:$0 sm:$0xff]  ;;  %v315_v39 = vld [vmem:[#allocation5 + $0x40] sm:$0xff]  ;;  %v316_v40 = vld [vmem:[#allocation5 + $0x48] sm:$0xff] }
  0x2b   :  { %872 = vmatprep.subr.bf16.mxu0 %v994_v0  ;;  %871 = vmatpush3.bf16.msra.mxu1 %v870_v13  ;;  %s1003_s11 = smov 16   ;;  %v879_v41 = vpack.c.bf16 %v316_v40, %v315_v39  ;;  %v757_v42 = vld [vmem:[#allocation5 + $0xb2] ss:$0 sm:$0xff]  ;;  %v396_v44 = vld [vmem:[#allocation5 + $0x58] sm:$0xff]  ;;  %v473_v50 = vld [vmem:[#allocation5 + $0x60] sm:$0xff]  ;;  %vm729_vm4 = vcmask 392320  }
  0x2c   :  { %878 = vmatprep.subr.bf16.mxu1 %v994_v0  ;;  %v395_v43 = vld [vmem:[#allocation5 + $0x50] sm:$0xff]  ;;  %v474_v51 = vld [vmem:[#allocation5 + $0x68] sm:$0xff]  ;;  %v476_v54 = vld [vmem:[#allocation5 + $0x78] sm:$0xff]  ;;  %s1004_s12 = smov [#allocation7]   ;;  %vm735_vm5 = vcmask 458112  }
  0x2d   :  { %803 = vmatmul.mubr.msk.f32.vlgmr.msra.gmra.mrb[0].mxu0 %vm46_vm1, %v1058_v5  ;;  %v882_v48 = vpack.c.bf16 %v396_v44, %v395_v43  ;;  %v885_v52 = vpack.c.bf16 %v474_v51, %v473_v50  ;;  %v475_v53 = vld [vmem:[#allocation5 + $0x70] sm:$0xff]  ;;  %v560_v3 = vld [vmem:[#allocation5 + $0xa0] sm:$0xff]  ;;  %v561_v4 = vld [vmem:[#allocation5 + $0xa8] sm:$0xff]  ;;  %s743_s13 = sshll.u32 %s1004_s12, 4  ;;  %s744_s13 = int_to_ptr.vmem [resolvable:$true] %s743_s13 }
  0x2e   :  { %820 = vmatprep.mubr.msk.f32.mxu0 %vm995_vm0, %v996_v1  ;;  %874 = vmatpush3.bf16.msra.mxu0 %v873_v16  ;;  %v888_v55 = vpack.c.bf16 %v476_v54, %v475_v53  ;;  %v759_v56 = vld [vmem:[#allocation5 + $0xb3] ss:$0 sm:$0xff]  ;;  %v761_v60 = vld [vmem:[#allocation5 + $0xb4] ss:$0 sm:$0xff]  ;;  %v559_v15 = vld [vmem:[#allocation5 + $0x98] sm:$0xff]  ;;  %s962_s14 = scalar_lea.vmem %s744_s13, 128  ;;  %p967_p3 = scmp.lt.s32.totalorder %s744_s13, %s744_s13 }
  0x2f   :  { %875 = vmatprep.subr.bf16.mxu0 %v994_v0  ;;  %v558_v14 = vld [vmem:[#allocation5 + $0x90] sm:$0xff]  ;;  %p963_p2 = scmp.ne.s32.totalorder %s744_s13, %s962_s14  ;;  %p968_p4 = scmp.lt.s32.totalorder %s962_s14, %s962_s14 }
  0x30   :  { %v897_v16 = vpack.c.bf16 %v559_v15, %v558_v14 }
  0x31   :  { %p969_p5 = por %p968_p4, %p967_p3 }
  0x32   :  { %877 = vmatpush3.bf16.msra.mxu0 %v876_v33 }
  0x33   :  { %884 = vmatprep.subr.bf16.mxu0 %v994_v0  ;;  %p970_p6 = pnand %p969_p5, %p963_p2 }
 0x100   :  { %v116_v7 = vpop.f32.mrb[0].mxu0 }
 0x101   :  { %v117_v8 = vadd.f32 %v753_v6, %v116_v7  ;;  %v804_v9 = vpop.f32.mrb[1].mxu0  ;;  %v763_v6 = vld [vmem:[#allocation5 + $0xb5] ss:$0 sm:$0xff]  ;;  %v556_v7 = vld [vmem:[#allocation5 + $0x80] sm:$0xff] }
 0x103   :  { %v120_v12 = vmax.f32 %v117_v8, 0.0  ;;  %v557_v8 = vld [vmem:[#allocation5 + $0x88] sm:$0xff] }
 0x105   :  { %130 = vrot.lane.b32.xlu1 %v120_v12, %s997_s1  ;;  %122 = vrot.lane.b32.xlu0 %v120_v12, %s998_s6 }
 0x109   :  { %134 = vrot.lane.b32.xlu1 %v120_v12, %s999_s7  ;;  %126 = vrot.lane.b32.xlu0 %v120_v12, %s1000_s8 }
 0x10d   :  { %142 = vrot.lane.b32.xlu1 %v120_v12, %s1001_s9  ;;  %138 = vrot.lane.b32.xlu0 %v120_v12, %s1002_s10 }
 0x111   :  { %146 = vrot.lane.b32.xlu0 %v120_v12, %s1003_s11 }
 0x177   :  { %v131_v17 = vpop.permute.xlu1 %130  ;;  %v123_v18 = vpop.permute.xlu0 %122 }
 0x178   :  { %v125_v19 = vmax.f32 %v120_v12, %v123_v18  ;;  %v894_v12 = vpack.c.bf16 %v557_v8, %v556_v7 }
 0x17b   :  { %v127_v20 = vpop.permute.xlu0 %126  ;;  %v135_v22 = vpop.permute.xlu1 %134 }
 0x17c   :  { %v129_v21 = vmax.f32 %v125_v19, %v127_v20  ;;  %v767_v20 = vld [vmem:[#allocation5 + $0xb6] ss:$0 sm:$0xff] }
 0x17e   :  { %v133_v23 = vmax.f32 %v129_v21, %v131_v17 }
 0x17f   :  { %v139_v24 = vpop.permute.xlu0 %138  ;;  %v143_v27 = vpop.permute.xlu1 %142 }
 0x180   :  { %v137_v25 = vmax.f32 %v133_v23, %v135_v22 }
 0x182   :  { %v141_v26 = vmax.f32 %v137_v25, %v139_v24 }
 0x183   :  { %v147_v29 = vpop.permute.xlu0 %146 }
 0x184   :  { %v145_v28 = vmax.f32 %v141_v26, %v143_v27 }
 0x186   :  { %v149_v30 = vmax.f32 %v145_v28, %v147_v29 }
 0x188   :  { %810 = vmatmul.mubr.msk.f32.vlgmr.msra.gmra.mrb[0].mxu1 %vm46_vm1, %v149_v30 }
 0x189   :  { %827 = vmatprep.mubr.msk.f32.mxu1 %vm995_vm0, %v996_v1  ;;  %880 = vmatpush3.bf16.msra.mxu1 %v879_v41 }
 0x18a   :  { %881 = vmatprep.subr.bf16.mxu1 %v994_v0 }
 0x25b   :  { %v226_v35 = vpop.f32.mrb[0].mxu1 }
 0x25c   :  { %v227_v36 = vadd.f32 %v755_v34, %v226_v35  ;;  %v811_v37 = vpop.f32.mrb[1].mxu1 }
 0x25e   :  { %v1073_v38 = vmax.f32 %v227_v36, 0.0 }
 0x260   :  { %821 = vmatmul.mubr.msk.f32.vlgmr.msra.gmra.mrb[2].mxu0 %vm240_vm2, %v1073_v38 }
 0x261   :  { %845 = vmatprep.mubr.msk.f32.mxu0 %vm995_vm0, %v996_v1  ;;  %886 = vmatpush3.bf16.msra.mxu0 %v885_v52 }
 0x262   :  { %887 = vmatprep.subr.bf16.mxu0 %v994_v0 }
 0x265   :  { %889 = vmatpush3.bf16.msra.mxu0 %v888_v55 }
 0x333   :  { %v310_v45 = vpop.f32.mrb[2].mxu0 }
 0x334   :  { %v311_v46 = vadd.f32 %v757_v42, %v310_v45  ;;  %v822_v47 = vpop.f32.mrb[3].mxu0 }
 0x336   :  { %v314_v49 = vmax.f32 %v311_v46, 0.0 }
 0x338   :  { %828 = vmatmul.mubr.msk.f32.vlgmr.msra.gmra.mrb[2].mxu1 %vm46_vm1, %v314_v49 }
 0x339   :  { %883 = vmatpush3.bf16.msra.mxu1 %v882_v48  ;;  %834 = vmatprep.mubr.msk.f32.mxu1 %vm995_vm0, %v996_v1 }
 0x33a   :  { %890 = vmatprep.subr.bf16.mxu1 %v994_v0 }
 0x33c   :  { %835 = vmatmul.mubr.msk.f32.vlgmr.msra.gmra.mrb[4].mxu1 %vm46_vm1, %v1058_v5  ;;  %v891_v5 = vpack.c.bf16 %v561_v4, %v560_v3 }
 0x33d   :  { %852 = vmatprep.mubr.msk.f32.mxu1 %vm995_vm0, %v996_v1 }
 0x33e   :  { %892 = vmatpush3.bf16.msra.mxu1 %v891_v5 }
 0x33f   :  { %893 = vmatprep.subr.bf16.mxu1 %v994_v0 }
 0x40b   :  { %v391_v57 = vpop.f32.mrb[2].mxu1 }
 0x40c   :  { %v392_v58 = vadd.f32 %v759_v56, %v391_v57  ;;  %v829_v59 = vpop.f32.mrb[3].mxu1 }
 0x40e   :  { %725 = vst.msk [vmem:[#allocation7] sm:$0xff] %vm46_vm1, %v392_v58 }
 0x40f   :  { %v468_v61 = vpop.f32.mrb[4].mxu1 }
 0x410   :  { %v469_v62 = vadd.f32 %v761_v60, %v468_v61  ;;  %v836_v63 = vpop.f32.mrb[5].mxu1 }
 0x412   :  { %v472_v2 = vmax.f32 %v469_v62, 0.0 }
 0x414   :  { %846 = vmatmul.mubr.msk.f32.vlgmr.msra.gmra.mrb[4].mxu0 %vm240_vm2, %v472_v2 }
 0x4e7   :  { %v551_v9 = vpop.f32.mrb[4].mxu0 }
 0x4e8   :  { %v552_v10 = vadd.f32 %v763_v6, %v551_v9  ;;  %v847_v11 = vpop.f32.mrb[5].mxu0 }
 0x4ea   :  { %v555_v13 = vmax.f32 %v552_v10, 0.0 }
 0x4ec   :  { %853 = vmatmul.mubr.msk.f32.vlgmr.msra.gmra.mrb[6].mxu1 %vm46_vm1, %v555_v13 }
 0x4ed   :  { %895 = vmatpush3.bf16.msra.mxu1 %v894_v12  ;;  %863 = vmatprep.mubr.msk.f32.mxu1 %vm995_vm0, %v996_v1 }
 0x4ee   :  { %896 = vmatprep.subr.bf16.mxu1 %v994_v0 }
 0x4f1   :  { %898 = vmatpush3.bf16.msra.mxu1 %v897_v16 }
 0x4f4   :  { %864 = vmatmul.mubr.msk.f32.vlgmr.msra.gmra.mrb[8].mxu1 %vm240_vm2, %v1073_v38 }
 0x5bf   :  { %v632_v17 = vpop.f32.mrb[6].mxu1 }
 0x5c0   :  { %v854_v18 = vpop.f32.mrb[7].mxu1 }
 0x5c7   :  { %v702_v19 = vpop.f32.mrb[8].mxu1 }
 0x5c8   :  { %v703_v21 = vadd.f32 %v702_v19, %v632_v17  ;;  %v865_v22 = vpop.f32.mrb[9].mxu1 }
 0x5ca   :  { %v710_v23 = vadd.f32 %v767_v20, %v703_v21 }
 0x5cc   :  { %v712_v24 = vsel %vm711_vm3, %v710_v23, -inf }
 0x5cd   :  { %713 = vmax.xlane.f32.xlu1 %v712_v24 }
 0x65a   :  { %v714_v25 = vpop.xlane.xlu1 %713 }
 0x65b   :  { %v715_v26 = vsub.f32 %v710_v23, %v714_v25 }
 0x65d   :  { %v716_v27 = vmul.f32 1.442695, %v715_v26 }
 0x65f   :  { %914 = vpow2.f32 %v716_v27 }
 0x669   :  { %v915_v1 = vpop.eup %914 }
 0x66a   :  { %v718_v0 = vsel %vm711_vm3, %v915_v1, 0.0 }
 0x66b   :  { %719 = vadd.xlane.f32.xlu0 %v718_v0 }
 0x681   :  { %726 = vrot.lane.b32.xlu0 %v1073_v38, %s1003_s11 }
 0x6f8   :  { %v720_v28 = vpop.xlane.xlu0 %719 }
 0x6f9   :  { %916 = vlog2.f32 %v720_v28 }
 0x6fc   :  { %v727_v29 = vpop.permute.xlu0 %726 }
 0x6fd   :  { %730 = vst.msk [vmem:[#allocation7] sm:$0xff] %vm729_vm4, %v727_v29 }
 0x703   :  { %v917_v30 = vpop.eup %916 }
 0x704   :  { %v722_v31 = vmul.f32 0.6931472, %v917_v30 }
 0x706   :  { %v723_v32 = vsub.f32 %v715_v26, %v722_v31 }
 0x708   :  { %732 = vrot.lane.b32.xlu1 %v723_v32, %s1002_s10 }
 0x77a   :  { %v733_v33 = vpop.permute.xlu1 %732 }
 0x77b   :  { %736 = vst.msk [vmem:[#allocation7] sm:$0xff] %vm735_vm5, %v733_v33 }
 0x77c   :  { %973 = shalt.err (!%p970_p6)
}
 0x77d   :  { %s974_s17 = scalar_lea.hbm %s1115_s2, 128 }
 0x77e   :  { %p975_p7 = scmp.ne.s32.totalorder %s1115_s2, %s974_s17  ;;  %p978_p8 = scmp.lt.u32.totalorder %s974_s17, %s1115_s2 }
 0x780   :  { %p980_p9 = pnand %p978_p8, %p975_p7 }
 0x782   :  { %983 = shalt.err (!%p980_p9)
}
 0x783   :  { %746 = dma.vmem_to_hbm [thread:$0]  %s744_s13, 128, %s1115_s2, [#allocation4]  }
 0x784   :  { %988 = dma.done.wait [#allocation4], 128  }
 0x785   :  { %989 = vsyncadd [#allocation4], 4294967168 }
 0x786   :  { %750 = vsyncpa [#allocation3], 1 }
 0x787   :  { %751 = vsyncpa [#allocation6], 1 }
 0x788   :  { %752 = vsyncpa [#allocation4], 1 }

</bundles_post_ra>
